<compile_context>
chip_gen: v7x
topology: tpu7x:2x2x1
jax: 0.10.0
libtpu: 0.0.40
codegen_flags: <defaults>
</compile_context>

<pallas_src>
import jax
import jax.numpy as jnp
from jax.experimental import pallas as pl
from jax.experimental.pallas import tpu as pltpu


def _ensemble_critic_kernel(x_ref, w1_ref, w2_ref, w3_ref, out_ref):
    # x_ref  : (TB, F+1)       last column is a constant-1 bias lane
    # w1_ref : (F+1, E*H1+1)   ensemble-fused layer-1 + bias row + 1-regenerating column
    # w2_ref : (E*H1+1, E*H2+1) block-diagonal layer-2 + bias row + 1-regenerating column
    # w3_ref : (E*H2+1, E*O)    block-diagonal layer-3 + bias row
    # out_ref: (TB, E*O)        lane-dense output slab
    h1 = jnp.maximum(
        jnp.dot(x_ref[...], w1_ref[...], preferred_element_type=jnp.float32), 0.0)
    h2 = jnp.maximum(
        jnp.dot(h1, w2_ref[...], preferred_element_type=jnp.float32), 0.0)
    out_ref[...] = jnp.dot(
        h2, w3_ref[...], preferred_element_type=jnp.float32).astype(out_ref.dtype)


def pack_params(params, dtype=jnp.float32):
    """One-time repack of per-member (w, b) into 3 fused matrices with biases folded in."""
    w1, b1 = params["w1"], params["b1"]    # (E, F, H1), (E, 1, H1)
    w2, b2 = params["w2"], params["b2"]    # (E, H1, H2), (E, 1, H2)
    w3, b3 = params["w3"], params["b3"]    # (E, H2, O), (E, 1, O)
    E, F, H1 = w1.shape
    H2 = w2.shape[2]
    O = w3.shape[2]

    # Layer 1: side-by-side ensemble fusion; W1[:, e*H1 + h] == w1[e, :, h].
    w1_cat = jnp.transpose(w1, (1, 0, 2)).reshape(F, E * H1)
    b1_cat = jnp.transpose(b1, (1, 0, 2)).reshape(E * H1)
    W1 = jnp.zeros((F + 1, E * H1 + 1), dtype)
    W1 = W1.at[:F, :E * H1].set(w1_cat.astype(dtype))
    W1 = W1.at[F, :E * H1].set(b1_cat.astype(dtype))
    W1 = W1.at[F, E * H1].set(1.0)          # regenerates the constant-1 lane

    eye = jnp.eye(E, dtype=dtype)

    # Layer 2: block-diagonal across the ensemble + bias row + constant-1 column.
    w2_bd = jnp.einsum("eio,ef->eifo", w2.astype(dtype), eye).reshape(E * H1, E * H2)
    b2_cat = jnp.transpose(b2, (1, 0, 2)).reshape(E * H2)
    W2 = jnp.zeros((E * H1 + 1, E * H2 + 1), dtype)
    W2 = W2.at[:E * H1, :E * H2].set(w2_bd)
    W2 = W2.at[E * H1, :E * H2].set(b2_cat.astype(dtype))
    W2 = W2.at[E * H1, E * H2].set(1.0)     # regenerates the constant-1 lane

    # Layer 3: block-diagonal + bias row (output stays E*O wide).
    w3_bd = jnp.einsum("eio,ef->eifo", w3.astype(dtype), eye).reshape(E * H2, E * O)
    b3_cat = jnp.transpose(b3, (1, 0, 2)).reshape(E * O)
    W3 = jnp.zeros((E * H2 + 1, E * O), dtype)
    W3 = W3.at[:E * H2, :].set(w3_bd)
    W3 = W3.at[E * H2, :].set(b3_cat.astype(dtype))
    return W1, W2, W3


def make_ensemble_critic(params, *, max_batch_tile=2048):
    """Returns a jitted forward(state, action) -> [B, E, out] with weights pre-packed."""
    W1, W2, W3 = pack_params(params)
    E = params["w1"].shape[0]
    O = params["w3"].shape[2]
    Fp1 = W1.shape[0]
    EO = W3.shape[1]

    @jax.jit
    def forward(state, action):
        B = state.shape[0]
        # Trace-time concat + constant-1 bias lane (one cheap lane move).
        x_aug = jnp.concatenate(
            [state, action, jnp.ones((B, 1), state.dtype)], axis=1).astype(jnp.float32)

        # Batch-tile grid: TB == B (single full block) when small, else 2048-row
        # tiles (multiple of 8 sublanes) so large batches pipeline automatically
        # while the packed weights stay VMEM-resident (constant index_map).
        TB = B if B <= max_batch_tile else max_batch_tile
        grid = (pl.cdiv(B, TB),)

        out_flat = pl.pallas_call(
            _ensemble_critic_kernel,
            out_shape=jax.ShapeDtypeStruct((B, EO), jnp.float32),
            grid=grid,
            in_specs=[
                pl.BlockSpec((TB, Fp1), lambda i: (i, 0)),
                pl.BlockSpec(W1.shape, lambda i: (0, 0)),
                pl.BlockSpec(W2.shape, lambda i: (0, 0)),
                pl.BlockSpec(W3.shape, lambda i: (0, 0)),
            ],
            out_specs=pl.BlockSpec((TB, EO), lambda i: (i, 0)),
            compiler_params=pltpu.CompilerParams(
                dimension_semantics=("parallel",)),
        )(x_aug, W1, W2, W3)

        # Row-major reshape reproduces torch.stack(..., dim=1): [B, E, O].
        return out_flat.reshape(B, E, O)

    return forward


def init_params(key, in_size, h1, h2, out_size, ensemble_size):
    """Deterministic init mimicking nn.Linear default (U(-1/sqrt(fan_in), ...))."""
    def linear(k, e, fi, fo):
        kw, kb = jax.random.split(k)
        bound = 1.0 / jnp.sqrt(fi)
        w = jax.random.uniform(kw, (e, fi, fo), jnp.float32, -bound, bound)
        b = jax.random.uniform(kb, (e, 1, fo), jnp.float32, -bound, bound)
        return w, b

    k1, k2, k3 = jax.random.split(key, 3)
    w1, b1 = linear(k1, ensemble_size, in_size, h1)
    w2, b2 = linear(k2, ensemble_size, h1, h2)
    w3, b3 = linear(k3, ensemble_size, h2, out_size)
    return {"w1": w1, "b1": b1, "w2": w2, "b2": b2, "w3": w3, "b3": b3}


def _reference(state, action, params):
    x = jnp.concatenate([state, action], axis=1)
    outs = []
    for e in range(params["w1"].shape[0]):
        h = jnp.maximum(x @ params["w1"][e] + params["b1"][e], 0.0)
        h = jnp.maximum(h @ params["w2"][e] + params["b2"][e], 0.0)
        outs.append(h @ params["w3"][e] + params["b3"][e])
    return jnp.stack(outs, axis=1)


if __name__ == "__main__":
    # Small shapes consistent with the module's forward:
    #   batch=2, state_dim=10, action_dim=4 -> input_size = 14
    #   hidden_sizes = [32, 32], output_size = 1, ensemble_size = 3
    B, S_DIM, A_DIM = 2, 10, 4
    H1, H2, OUT, E = 32, 32, 1, 3

    key = jax.random.PRNGKey(0)
    k_state, k_action, k_params = jax.random.split(key, 3)
    state = jax.random.normal(k_state, (B, S_DIM), jnp.float32)
    action = jax.random.normal(k_action, (B, A_DIM), jnp.float32)
    params = init_params(k_params, S_DIM + A_DIM, H1, H2, OUT, E)

    forward = make_ensemble_critic(params)      # weight repacking hoisted (done once)
    q = forward(state, action)                  # [B, E, OUT]
    q = jax.block_until_ready(q)

    ref = _reference(state, action, params)
    assert q.shape == (B, E, OUT), q.shape
    assert jnp.allclose(q, ref, atol=1e-5, rtol=1e-5), "mismatch vs reference"

    print("KERNEL_OK")
</pallas_src>

<mosaic_0001>
module attributes {stable_mosaic.version = 11 : i64} {
  func.func @_ensemble_critic_kernel(%arg0: i32, %arg1: memref<2x15xf32, #tpu.memory_space<vmem>>, %arg2: memref<15x97xf32, #tpu.memory_space<vmem>>, %arg3: memref<97x97xf32, #tpu.memory_space<vmem>>, %arg4: memref<97x3xf32, #tpu.memory_space<vmem>>, %arg5: memref<2x3xf32, #tpu.memory_space<vmem>>) attributes {dimension_semantics = [#tpu.dimension_semantics<parallel>], iteration_bounds = array<i64: 1>, scalar_prefetch = 0 : i64, scratch_operands = 0 : i64, tpu.core_type = #tpu.core_type<tc>, window_params = [{transform_indices = @transform_0, window_bounds = array<i64: 2, 15>}, {pipeline_mode = #tpu.pipeline_mode<synchronous>, transform_indices = @transform_1, window_bounds = array<i64: 15, 97>}, {pipeline_mode = #tpu.pipeline_mode<synchronous>, transform_indices = @transform_2, window_bounds = array<i64: 97, 97>}, {pipeline_mode = #tpu.pipeline_mode<synchronous>, transform_indices = @transform_3, window_bounds = array<i64: 97, 3>}, {transform_indices = @transform_4, window_bounds = array<i64: 2, 3>}]} {
    %c0 = arith.constant 0 : index
    %c0_0 = arith.constant 0 : index
    %0 = vector.load %arg1[%c0, %c0_0] : memref<2x15xf32, #tpu.memory_space<vmem>>, vector<2x15xf32>
    %c0_1 = arith.constant 0 : index
    %c0_2 = arith.constant 0 : index
    %1 = vector.load %arg2[%c0_1, %c0_2] : memref<15x97xf32, #tpu.memory_space<vmem>>, vector<15x97xf32>
    %cst = arith.constant dense<0.000000e+00> : vector<2x97xf32>
    %2 = tpu.matmul %0, %1, %cst {dimension_numbers = #tpu.dot_dimension_numbers<[1], [0], [0], [1], [0, 0, 1, 1], [], []>} : vector<2x15xf32>, vector<15x97xf32>, vector<2x97xf32> -> vector<2x97xf32>
    %cst_3 = arith.constant 0.000000e+00 : f32
    %3 = vector.broadcast %cst_3 : f32 to vector<2x97xf32>
    %4 = arith.maximumf %2, %3 : vector<2x97xf32>
    %c0_4 = arith.constant 0 : index
    %c0_5 = arith.constant 0 : index
    %5 = vector.load %arg3[%c0_4, %c0_5] : memref<97x97xf32, #tpu.memory_space<vmem>>, vector<97x97xf32>
    %cst_6 = arith.constant dense<0.000000e+00> : vector<2x97xf32>
    %6 = tpu.matmul %4, %5, %cst_6 {dimension_numbers = #tpu.dot_dimension_numbers<[1], [0], [0], [1], [0, 0, 1, 1], [], []>} : vector<2x97xf32>, vector<97x97xf32>, vector<2x97xf32> -> vector<2x97xf32>
    %cst_7 = arith.constant 0.000000e+00 : f32
    %7 = vector.broadcast %cst_7 : f32 to vector<2x97xf32>
    %8 = arith.maximumf %6, %7 : vector<2x97xf32>
    %c0_8 = arith.constant 0 : index
    %c0_9 = arith.constant 0 : index
    %9 = vector.load %arg4[%c0_8, %c0_9] : memref<97x3xf32, #tpu.memory_space<vmem>>, vector<97x3xf32>
    %cst_10 = arith.constant dense<0.000000e+00> : vector<2x3xf32>
    %10 = tpu.matmul %8, %9, %cst_10 {dimension_numbers = #tpu.dot_dimension_numbers<[1], [0], [0], [1], [0, 0, 1, 1], [], []>} : vector<2x97xf32>, vector<97x3xf32>, vector<2x3xf32> -> vector<2x3xf32>
    %c0_11 = arith.constant 0 : index
    %c0_12 = arith.constant 0 : index
    %11 = vector.load %arg5[%c0_11, %c0_12] : memref<2x3xf32, #tpu.memory_space<vmem>>, vector<2x3xf32>
    tpu.vector_store %arg5[%c0_11, %c0_12], %10 {strides = array<i32>} : memref<2x3xf32, #tpu.memory_space<vmem>>, vector<2x3xf32>,
    return
  }
  func.func @transform_0(%arg0: i32) -> (i32, i32) {
    %c0_i32 = arith.constant 0 : i32
    %c0_i32_0 = arith.constant 0 : i32
    return %arg0, %c0_i32 : i32, i32
  }
  func.func @transform_1(%arg0: i32) -> (i32, i32) {
    %c0_i32 = arith.constant 0 : i32
    %c0_i32_0 = arith.constant 0 : i32
    %c0_i32_1 = arith.constant 0 : i32
    return %c0_i32, %c0_i32_0 : i32, i32
  }
  func.func @transform_2(%arg0: i32) -> (i32, i32) {
    %c0_i32 = arith.constant 0 : i32
    %c0_i32_0 = arith.constant 0 : i32
    %c0_i32_1 = arith.constant 0 : i32
    return %c0_i32, %c0_i32_0 : i32, i32
  }
  func.func @transform_3(%arg0: i32) -> (i32, i32) {
    %c0_i32 = arith.constant 0 : i32
    %c0_i32_0 = arith.constant 0 : i32
    %c0_i32_1 = arith.constant 0 : i32
    return %c0_i32, %c0_i32_0 : i32, i32
  }
  func.func @transform_4(%arg0: i32) -> (i32, i32) {
    %c0_i32 = arith.constant 0 : i32
    %c0_i32_0 = arith.constant 0 : i32
    return %arg0, %c0_i32 : i32, i32
  }
}

</mosaic_0001>

<bundles_post_ra>
// kernel: forward.1
= control target key start
LH: loop header
LB: loop body
LE: loop exit
PB: predicated region body
PF: predicated region fallthrough
CT: control target
= control target key end

     0   :  { %9 = vsyncpa [#allocation3], 0  ;;  %s652_s0 = inlined_call_operand.vmem [shape: f32[2,15], index: 0, kind: input, shape index: {}]   ;;  %s653_s1 = inlined_call_operand.vmem [shape: f32[15,97], index: 1, kind: input, shape index: {}]   ;;  %s654_s2 = inlined_call_operand.hbm [shape: f32[97,97], index: 2, kind: input, shape index: {}]   ;;  %s655_s3 = inlined_call_operand.hbm [shape: f32[97,3], index: 3, kind: input, shape index: {}]   ;;  %s656_s4 = inlined_call_operand.hbm [shape: f32[2,3], index: 4, kind: output, shape index: {}]  }
   0x1   :  { %10 = vsyncpa [#allocation6], 0 }
   0x2   :  { %11 = vsyncpa [#allocation4], 0  ;;  %s550_s15 = smov [#allocation2]   ;;  %s478_s19 = scalar_lea.hbm %s654_s2, 1664 }
   0x3   :  { %s21_s16 = sshll.u32 %s550_s15, 4  ;;  %p479_p0 = scmp.ne.s32.totalorder %s654_s2, %s478_s19  ;;  %s22_s16 = int_to_ptr.vmem [resolvable:$true] %s21_s16 }
   0x4   :  { %p482_p1 = scmp.lt.u32.totalorder %s478_s19, %s654_s2 }
   0x6   :  { %p484_p2 = pnand %p482_p1, %p479_p0 }
   0x8   :  { %487 = shalt.err (!%p484_p2)
}
   0x9   :  { %s488_s24 = scalar_lea.vmem %s22_s16, 1664  ;;  %p493_p4 = scmp.lt.s32.totalorder %s22_s16, %s22_s16 }
   0xa   :  { %p489_p3 = scmp.ne.s32.totalorder %s22_s16, %s488_s24  ;;  %p494_p5 = scmp.lt.s32.totalorder %s488_s24, %s488_s24 }
   0xc   :  { %p495_p6 = por %p494_p5, %p493_p4 }
   0xe   :  { %p496_p7 = pnand %p495_p6, %p489_p3 }
  0x10   :  { %499 = shalt.err (!%p496_p7)
}
  0x11   :  { %s551_s25 = smov 128   ;;  %s552_s26 = smov 8  }
  0x12   :  { %27 = dma.hbm_to_vmem [thread:$0]  %s654_s2, 1664, %s22_s16, [#allocation3], %s551_s25, %s551_s25, %s552_s26  }
  0x13   :  { %s553_s29 = smov [#allocation5]   ;;  %s500_s7 = scalar_lea.hbm %s655_s3, 1664 }
  0x14   :  { %s33_s30 = sshll.u32 %s553_s29, 4  ;;  %p501_p8 = scmp.ne.s32.totalorder %s655_s3, %s500_s7  ;;  %s34_s30 = int_to_ptr.vmem [resolvable:$true] %s33_s30 }
  0x15   :  { %p504_p9 = scmp.lt.u32.totalorder %s500_s7, %s655_s3 }
  0x17   :  { %p506_p10 = pnand %p504_p9, %p501_p8 }
  0x19   :  { %509 = shalt.err (!%p506_p10)
}
  0x1a   :  { %s510_s12 = scalar_lea.vmem %s34_s30, 1664  ;;  %p515_p12 = scmp.lt.s32.totalorder %s34_s30, %s34_s30 }
  0x1b   :  { %p511_p11 = scmp.ne.s32.totalorder %s34_s30, %s510_s12  ;;  %p516_p13 = scmp.lt.s32.totalorder %s510_s12, %s510_s12 }
  0x1d   :  { %p517_p0 = por %p516_p13, %p515_p12 }
  0x1f   :  { %p518_p1 = pnand %p517_p0, %p511_p11 }
  0x21   :  { %521 = shalt.err (!%p518_p1)
}
  0x22   :  { %39 = dma.hbm_to_vmem [thread:$0]  %s655_s3, 1664, %s34_s30, [#allocation6], %s551_s25, %s551_s25, %s552_s26  }
  0x23   :  { %544 = dma.done.wait [#allocation3], 1664  }
  0x24   :  { %545 = vsyncadd [#allocation3], 4294965632 }
  0x25   :  { %546 = dma.done.wait [#allocation6], 1664  }
  0x26   :  { %547 = vsyncadd [#allocation6], 4294965632  ;;  %v554_v0 = vmov 0.0|0.0   ;;  %vm555_vm0 = vmmov 0   ;;  %v556_v1 = vmov 0.0   ;;  %vm53_vm1 = vcmask 1046528  }
  0x27   :  { %429 = vmatprep.subr.bf16.mxu0 %v554_v0  ;;  %433 = vmatprep.subr.bf16.mxu1 %v554_v0  ;;  %v47_v2 = vld [vmem:[%s653_s1] sm:$0xff]  ;;  %v48_v3 = vld [vmem:[%s653_s1 + $0x8] sm:$0x7f]  ;;  %vm557_vm2 = vmmov 1   ;;  %v130_v7 = vld [vmem:[#allocation2 + $0x10] sm:$0xff]  ;;  %vm49_vm4 = vcmask 121856  }
  0x28   :  { %368 = vmatprep.mubr.msk.f32.mxu0 %vm555_vm0, %v556_v1  ;;  %397 = vmatprep.mubr.msk.f32.mxu1 %vm555_vm0, %v556_v1  ;;  %vm431_vm3 = vmpackc.low %vm53_vm1, %vm557_vm2  ;;  %v430_v4 = vpack.c.bf16 %v48_v3, %v47_v2  ;;  %v128_v5 = vld [vmem:[#allocation2] sm:$0xff]  ;;  %v129_v6 = vld [vmem:[#allocation2 + $0x8] sm:$0xff]  ;;  %vm145_vm5 = vcmask 1040384   ;;  %vm141_vm6 = vcmask 793600   ;;  %vm309_vm7 = vcmask 17408  }
  0x29   :  { %v434_v8 = vpack.c.bf16 %v129_v6, %v128_v5  ;;  %v131_v9 = vld [vmem:[#allocation2 + $0x18] sm:$0xff]  ;;  %v46_v10 = vld [vmem:[%s652_s0] sm:$0x3]  ;;  %v133_v13 = vld [vmem:[#allocation2 + $0x28] sm:$0xff]  ;;  %s558_s0 = smov [#allocation7]  }
  0x2a   :  { %432 = vmatpush3.bf16.msk.msra.mxu0 %vm431_vm3, %v430_v4  ;;  %v437_v11 = vpack.c.bf16 %v131_v9, %v130_v7  ;;  %v132_v12 = vld [vmem:[#allocation2 + $0x20] sm:$0xff]  ;;  %v134_v15 = vld [vmem:[#allocation2 + $0x30] sm:$0xff]  ;;  %v135_v16 = vld [vmem:[#allocation2 + $0x38] sm:$0xff]  ;;  %s317_s1 = sshll.u32 %s558_s0, 4  ;;  %s318_s1 = int_to_ptr.vmem [resolvable:$true] %s317_s1 }
  0x2b   :  { %435 = vmatpush3.bf16.msra.mxu1 %v434_v8  ;;  %451 = vmatprep.subr.bf16.mxu0 %v554_v0  ;;  %v440_v14 = vpack.c.bf16 %v133_v13, %v132_v12  ;;  %v443_v17 = vpack.c.bf16 %v135_v16, %v134_v15  ;;  %v136_v18 = vld [vmem:[#allocation2 + $0x40] sm:$0xff]  ;;  %v137_v19 = vld [vmem:[#allocation2 + $0x48] sm:$0xff]  ;;  %v138_v21 = vld [vmem:[#allocation2 + $0x50] sm:$0xff]  ;;  %s522_s19 = scalar_lea.vmem %s318_s1, 32  ;;  %p527_p3 = scmp.lt.s32.totalorder %s318_s1, %s318_s1 }
  0x2c   :  { %436 = vmatprep.subr.bf16.mxu1 %v554_v0  ;;  %v446_v20 = vpack.c.bf16 %v137_v19, %v136_v18  ;;  %v139_v22 = vld [vmem:[#allocation2 + $0x58] sm:$0xff]  ;;  %v140_v24 = vld [vmem:[#allocation2 + $0x60] sm:$0x1]  ;;  %v220_v25 = vld [vmem:[#allocation5] sm:$0xff]  ;;  %p523_p2 = scmp.ne.s32.totalorder %s318_s1, %s522_s19  ;;  %p528_p4 = scmp.lt.s32.totalorder %s522_s19, %s522_s19 }
  0x2d   :  { %369 = vmatmul.mubr.msk.f32.vlgmr.msra.gmra.mrb[0].mxu0 %vm49_vm4, %v46_v10  ;;  %v449_v23 = vpack.c.bf16 %v139_v22, %v138_v21  ;;  %v221_v26 = vld [vmem:[#allocation5 + $0x8] sm:$0xff]  ;;  %v222_v27 = vld [vmem:[#allocation5 + $0x10] sm:$0xff]  ;;  %v223_v29 = vld [vmem:[#allocation5 + $0x18] sm:$0xff] }
  0x2e   :  { %426 = vmatprep.mubr.msk.f32.mxu0 %vm555_vm0, %v556_v1  ;;  %v452_v28 = vpack.c.bf16 %v221_v26, %v220_v25  ;;  %v455_v30 = vpack.c.bf16 %v223_v29, %v222_v27  ;;  %v224_v31 = vld [vmem:[#allocation5 + $0x20] sm:$0xff]  ;;  %v225_v32 = vld [vmem:[#allocation5 + $0x28] sm:$0xff]  ;;  %v226_v34 = vld [vmem:[#allocation5 + $0x30] sm:$0xff]  ;;  %p529_p5 = por %p528_p4, %p527_p3 }
  0x2f   :  { %438 = vmatpush3.bf16.msra.mxu1 %v437_v11  ;;  %v458_v33 = vpack.c.bf16 %v225_v32, %v224_v31  ;;  %v227_v35 = vld [vmem:[#allocation5 + $0x38] sm:$0xff]  ;;  %v228_v37 = vld [vmem:[#allocation5 + $0x40] sm:$0xff]  ;;  %v229_v38 = vld [vmem:[#allocation5 + $0x48] sm:$0xff] }
  0x30   :  { %439 = vmatprep.subr.bf16.mxu1 %v554_v0  ;;  %453 = vmatpush3.bf16.msra.mxu0 %v452_v28  ;;  %v461_v36 = vpack.c.bf16 %v227_v35, %v226_v34  ;;  %v464_v39 = vpack.c.bf16 %v229_v38, %v228_v37  ;;  %v230_v40 = vld [vmem:[#allocation5 + $0x50] sm:$0xff]  ;;  %v231_v41 = vld [vmem:[#allocation5 + $0x58] sm:$0xff]  ;;  %v232_v46 = vld [vmem:[#allocation5 + $0x60] sm:$0x1]  ;;  %p530_p6 = pnand %p529_p5, %p523_p2 }
  0x31   :  { %454 = vmatprep.subr.bf16.mxu0 %v554_v0  ;;  %v467_v42 = vpack.c.bf16 %v231_v41, %v230_v40 }
  0x33   :  { %441 = vmatpush3.bf16.msra.mxu1 %v440_v14 }
  0x34   :  { %442 = vmatprep.subr.bf16.mxu1 %v554_v0  ;;  %456 = vmatpush3.bf16.msra.mxu0 %v455_v30 }
  0x35   :  { %457 = vmatprep.subr.bf16.mxu0 %v554_v0 }
  0x37   :  { %444 = vmatpush3.bf16.msra.mxu1 %v443_v17 }
  0x38   :  { %445 = vmatprep.subr.bf16.mxu1 %v554_v0  ;;  %459 = vmatpush3.bf16.msra.mxu0 %v458_v33 }
  0x39   :  { %460 = vmatprep.subr.bf16.mxu0 %v554_v0 }
  0x3b   :  { %447 = vmatpush3.bf16.msra.mxu1 %v446_v20 }
  0x3c   :  { %448 = vmatprep.subr.bf16.mxu1 %v554_v0  ;;  %462 = vmatpush3.bf16.msra.mxu0 %v461_v36 }
  0x3d   :  { %463 = vmatprep.subr.bf16.mxu0 %v554_v0 }
  0x3f   :  { %450 = vmatpush3.bf16.msra.mxu1 %v449_v23 }
  0x40   :  { %395 = vmatprep.subr.mxu1 %v556_v1  ;;  %465 = vmatpush3.bf16.msra.mxu0 %v464_v39 }
  0x41   :  { %466 = vmatprep.subr.bf16.mxu0 %v554_v0 }
  0x43   :  { %396 = vmatpush3.msk.msra.mxu1 %vm145_vm5, %v140_v24 }
  0x44   :  { %468 = vmatpush3.bf16.msra.mxu0 %v467_v42 }
  0x45   :  { %424 = vmatprep.subr.mxu0 %v556_v1 }
  0x48   :  { %425 = vmatpush3.msk.msra.mxu0 %vm145_vm5, %v232_v46 }
 0x100   :  { %v123_v43 = vpop.f32.mrb[0].mxu0 }
 0x101   :  { %v127_v44 = vmax.f32 %v123_v43, 0.0  ;;  %v370_v45 = vpop.f32.mrb[1].mxu0 }
 0x103   :  { %398 = vmatmul.mubr.msk.f32.vlgmr.msra.gmra.mrb[0].mxu1 %vm141_vm6, %v127_v44 }
 0x1d6   :  { %v215_v47 = vpop.f32.mrb[0].mxu1 }
 0x1d7   :  { %v219_v48 = vmax.f32 %v215_v47, 0.0  ;;  %v399_v49 = vpop.f32.mrb[1].mxu1 }
 0x1d9   :  { %427 = vmatmul.mubr.msk.f32.vlgmr.msra.gmra.mrb[2].mxu0 %vm141_vm6, %v219_v48 }
 0x2ac   :  { %v305_v50 = vpop.f32.mrb[2].mxu0 }
 0x2ad   :  { %v428_v51 = vpop.f32.mrb[3].mxu0  ;;  %310 = vst.msk [vmem:[#allocation7] sm:$0x3] %vm309_vm7, %v305_v50 }
 0x2ae   :  { %533 = shalt.err (!%p530_p6)
}
 0x2af   :  { %s534_s22 = scalar_lea.hbm %s656_s4, 32 }
 0x2b0   :  { %p535_p7 = scmp.ne.s32.totalorder %s656_s4, %s534_s22  ;;  %p538_p8 = scmp.lt.u32.totalorder %s534_s22, %s656_s4 }
 0x2b2   :  { %p540_p9 = pnand %p538_p8, %p535_p7 }
 0x2b4   :  { %543 = shalt.err (!%p540_p9)
}
 0x2b5   :  { %320 = dma.vmem_to_hbm [thread:$0]  %s318_s1, 32, %s656_s4, [#allocation4]  }
 0x2b6   :  { %548 = dma.done.wait [#allocation4], 32  }
 0x2b7   :  { %549 = vsyncadd [#allocation4], 4294967264 }
 0x2b8   :  { %324 = vsyncpa [#allocation3], 1 }
 0x2b9   :  { %325 = vsyncpa [#allocation6], 1 }
 0x2ba   :  { %326 = vsyncpa [#allocation4], 1 }

</bundles_post_ra>
